<compile_context>
chip_gen: v6e
topology: v6e:2x2x1
jax: 0.10.0
libtpu: 0.0.40
codegen_flags: <defaults>
</compile_context>

<pallas_src>
import numpy as np
import jax
import jax.numpy as jnp
from jax.experimental import pallas as pl
from jax.experimental.pallas import tpu as pltpu

# ------------------ small, deterministic model config ------------------
HIDDEN = 32                 # hidden_size
ITEM_NUM = 64               # item_num (embedding has ITEM_NUM+1 rows; pad id == ITEM_NUM)
STATE_SIZE = 8              # sequence length L
NUM_FILTERS = 4             # num_filters per filter size
FILTER_SIZES = (2, 3, 4)    # eval(filter_sizes)
NUM_FILTERS_TOTAL = NUM_FILTERS * len(FILTER_SIZES)     # 12
FINAL_DIM = HIDDEN + NUM_FILTERS_TOTAL                  # 44
MAX_FS = max(FILTER_SIZES)                              # 4
MIN_FS = min(FILTER_SIZES)                              # 2
T_MAX = STATE_SIZE - MIN_FS + 1                         # 7 windows (longest block)

# ------------------ kernel tiling constants ------------------
TB = 8                      # batch tile (sublane multiple); grid is over batch tiles
L_PAD = 16                  # time padded to a sublane-tile multiple >= L + MAX_FS - 1
assert L_PAD % 8 == 0 and L_PAD >= STATE_SIZE + MAX_FS - 1
AUX_COLS = TB * L_PAD       # 128 (lane-dense aux block / vertical-conv selector width)
ROW_HB = TB                 # aux row holding horizontal-conv biases
ROW_VB = TB + 1             # aux row holding vertical-conv bias
ROW_MASK = TB + 2           # aux rows holding (T_MAX, F_total) window-validity mask
AUX_ROWS = ROW_MASK + T_MAX
N_PAD = 128                 # item axis padded to lane width for dense stores
# TODO(synk): training-mode dropout (PRNG + inverted scaling) not implemented; eval semantics only.


def caser_kernel(emb_ref, wh_ref, aux_ref, fcw_ref, fcb_ref, out_ref):
    # emb_ref: (TB*L_PAD, H) -- batch tile, time zero-padded to L_PAD, flattened rows.
    emb_flat = emb_ref[...]                                          # (TB*L_PAD, H) f32

    # --- horizontal convolutions: MAX_FS fused matmuls, shift-add, relu, masked max-pool ---
    conv = None
    for i in range(MAX_FS):
        # one big matmul per time-offset over all filter sizes at once
        p = jnp.dot(emb_flat, wh_ref[i], preferred_element_type=jnp.float32)  # (TB*L_PAD, F_total)
        p = p.reshape(TB, L_PAD, NUM_FILTERS_TOTAL)
        win = p[:, i:i + T_MAX, :]                                   # shifted window view
        conv = win if conv is None else conv + win                   # (TB, T_MAX, F_total)

    hb = aux_ref[ROW_HB:ROW_HB + 1, 0:NUM_FILTERS_TOTAL]             # (1, F_total)
    conv = jnp.maximum(conv + hb.reshape(1, 1, NUM_FILTERS_TOTAL), 0.0)
    # zero out windows that are out-of-range for a given filter size (relu>=0 so
    # zeros never win the max over the valid windows)
    valid = aux_ref[ROW_MASK:ROW_MASK + T_MAX, 0:NUM_FILTERS_TOTAL]  # (T_MAX, F_total)
    conv = conv * valid.reshape(1, T_MAX, NUM_FILTERS_TOTAL)
    pooled = jnp.max(conv, axis=1)                                   # (TB, F_total)

    # --- vertical convolution as one matmul with a host-built selection matrix ---
    vwsel = aux_ref[0:TB, :]                                         # (TB, TB*L_PAD)
    vb = aux_ref[ROW_VB:ROW_VB + 1, 0:1]                             # (1, 1)
    v = jnp.dot(vwsel, emb_flat, preferred_element_type=jnp.float32) + vb
    v = jnp.maximum(v, 0.0)                                          # (TB, H)

    # --- fused final linear: one dot over concat([pooled, v]), lane-dense output ---
    feat = jnp.concatenate([pooled, v], axis=1)                      # (TB, FINAL_DIM)
    out_ref[...] = (jnp.dot(feat, fcw_ref[...], preferred_element_type=jnp.float32)
                    + fcb_ref[...])                                  # (TB, N_PAD)


@jax.jit
def caser_forward(states, params):
    """params: item_emb (raw) + packed kernel params (wh_fused, aux, fcw_t_pad, fcb_pad)."""
    B, L = states.shape
    emb = jnp.take(params["item_emb"], states, axis=0)               # (B, L, H)
    mask = (states != ITEM_NUM).astype(emb.dtype)[..., None]
    emb = emb * mask

    # pad batch to a multiple of TB and time to L_PAD, flatten to lane-friendly 2D
    B_pad = ((B + TB - 1) // TB) * TB
    emb = jnp.pad(emb, ((0, B_pad - B), (0, L_PAD - L), (0, 0)))
    emb_flat = emb.reshape(B_pad * L_PAD, HIDDEN)

    out = pl.pallas_call(
        caser_kernel,
        out_shape=jax.ShapeDtypeStruct((B_pad, N_PAD), jnp.float32),
        grid=(B_pad // TB,),
        in_specs=[
            pl.BlockSpec((TB * L_PAD, HIDDEN), lambda b: (b, 0)),                    # emb tile
            pl.BlockSpec((MAX_FS, HIDDEN, NUM_FILTERS_TOTAL), lambda b: (0, 0, 0)),  # fused conv W
            pl.BlockSpec((AUX_ROWS, AUX_COLS), lambda b: (0, 0)),                    # packed scalars
            pl.BlockSpec((FINAL_DIM, N_PAD), lambda b: (0, 0)),                      # fc weight^T (padded)
            pl.BlockSpec((1, N_PAD), lambda b: (0, 0)),                              # fc bias (padded)
        ],
        out_specs=pl.BlockSpec((TB, N_PAD), lambda b: (b, 0)),
        compiler_params=pltpu.CompilerParams(
            dimension_semantics=("parallel",)),
    )(emb_flat, params["wh_fused"], params["aux"], params["fcw_t_pad"], params["fcb_pad"])

    return out[:B, :ITEM_NUM]


def init_params(key):
    """Raw parameters mirroring the PyTorch module's initializers."""
    ks = jax.random.split(key, 6)
    # nn.Embedding(item_num+1, hidden), normal(0, 0.01)
    item_emb = 0.01 * jax.random.normal(ks[0], (ITEM_NUM + 1, HIDDEN), jnp.float32)

    # horizontal Conv2d(1, F, (fs, H)) weights, xavier-normal, bias 0.1
    hw = []
    for j, fs in enumerate(FILTER_SIZES):
        fan_in = fs * HIDDEN
        fan_out = NUM_FILTERS * fs * HIDDEN
        std = (2.0 / (fan_in + fan_out)) ** 0.5
        w = std * jax.random.normal(jax.random.fold_in(ks[1], j),
                                    (NUM_FILTERS, fs, HIDDEN), jnp.float32)
        hw.append(w)
    hb = jnp.full((len(FILTER_SIZES), NUM_FILTERS), 0.1, jnp.float32)

    # vertical Conv2d(1, 1, (L, 1)): weight (1,1,L,1) -> (1, L), bias 0.1
    v_std = (2.0 / (STATE_SIZE + STATE_SIZE)) ** 0.5
    vw = v_std * jax.random.normal(ks[2], (1, STATE_SIZE), jnp.float32)
    vb = jnp.full((1, 1), 0.1, jnp.float32)

    # nn.Linear(final_dim, item_num): y = x @ W.T + b, default uniform init
    bound = 1.0 / (FINAL_DIM ** 0.5)
    fcw = jax.random.uniform(ks[3], (ITEM_NUM, FINAL_DIM), jnp.float32, -bound, bound)
    fcb = jax.random.uniform(ks[4], (1, ITEM_NUM), jnp.float32, -bound, bound)

    return dict(item_emb=item_emb, hw=hw, hb=hb, vw=vw, vb=vb, fcw=fcw, fcb=fcb)


def pack_params(raw):
    """Host-side fusing / transposing / padding of parameters for the kernel."""
    # fused horizontal conv weights: (MAX_FS, H, F_total), zero rows for offsets >= fs
    wh_fused = np.zeros((MAX_FS, HIDDEN, NUM_FILTERS_TOTAL), np.float32)
    for idx, fs in enumerate(FILTER_SIZES):
        w = np.asarray(raw["hw"][idx])                               # (F, fs, H)
        for i in range(fs):
            wh_fused[i, :, idx * NUM_FILTERS:(idx + 1) * NUM_FILTERS] = w[:, i, :].T

    # aux block: vertical-conv selector rows, biases, window-validity mask
    aux = np.zeros((AUX_ROWS, AUX_COLS), np.float32)
    vw = np.asarray(raw["vw"])[0]                                    # (L,)
    for j in range(TB):                                              # block-diagonal selector
        aux[j, j * L_PAD: j * L_PAD + STATE_SIZE] = vw
    aux[ROW_HB, :NUM_FILTERS_TOTAL] = np.asarray(raw["hb"]).reshape(-1)
    aux[ROW_VB, 0] = np.asarray(raw["vb"])[0, 0]
    for idx, fs in enumerate(FILTER_SIZES):
        aux[ROW_MASK: ROW_MASK + (STATE_SIZE - fs + 1),
            idx * NUM_FILTERS:(idx + 1) * NUM_FILTERS] = 1.0

    # final linear: W.T with item axis zero-padded to 128 lanes
    fcw_t_pad = np.zeros((FINAL_DIM, N_PAD), np.float32)
    fcw_t_pad[:, :ITEM_NUM] = np.asarray(raw["fcw"]).T
    fcb_pad = np.zeros((1, N_PAD), np.float32)
    fcb_pad[:, :ITEM_NUM] = np.asarray(raw["fcb"])

    return dict(wh_fused=jnp.asarray(wh_fused), aux=jnp.asarray(aux),
                fcw_t_pad=jnp.asarray(fcw_t_pad), fcb_pad=jnp.asarray(fcb_pad))


def caser_reference(states, raw):
    """Pure-JAX reference (mirrors the PyTorch forward) for validation."""
    emb = jnp.take(raw["item_emb"], states, axis=0)
    mask = (states != ITEM_NUM).astype(jnp.float32)[..., None]
    emb = emb * mask
    B, L, H = emb.shape
    pooled_all = []
    for idx, fs in enumerate(FILTER_SIZES):
        W = raw["hw"][idx].reshape(NUM_FILTERS, fs * H)
        wins = jnp.stack([emb[:, t:t + fs, :].reshape(B, fs * H)
                          for t in range(L - fs + 1)], axis=1)        # (B, T, fs*H)
        conv = jnp.einsum('btd,fd->btf', wins, W) + raw["hb"][idx][None, None, :]
        pooled_all.append(jax.nn.relu(conv).max(axis=1))              # (B, F)
    h_pool = jnp.concatenate(pooled_all, axis=1)                      # (B, F_total)
    v = jax.nn.relu(jnp.einsum('blh,l->bh', emb, raw["vw"][0]) + raw["vb"][0, 0])
    feat = jnp.concatenate([h_pool, v], axis=1)                       # (B, FINAL_DIM)
    return feat @ raw["fcw"].T + raw["fcb"]


if __name__ == "__main__":
    key = jax.random.PRNGKey(0)
    raw = init_params(key)
    packed = pack_params(raw)
    params = dict(item_emb=raw["item_emb"], **packed)

    B = 20                                                            # exercises batch padding + 3 grid steps
    states = jax.random.randint(jax.random.PRNGKey(1), (B, STATE_SIZE),
                                0, ITEM_NUM + 1, dtype=jnp.int32)     # includes pad id
    len_states = jnp.full((B,), STATE_SIZE, dtype=jnp.int32)          # unused by forward

    out = caser_forward(states, params)
    jax.block_until_ready(out)

    ref = caser_reference(states, raw)
    assert out.shape == (B, ITEM_NUM)
    assert jnp.allclose(out, ref, atol=1e-4, rtol=1e-4), "mismatch vs reference"
    print("KERNEL_OK")
</pallas_src>

<mosaic_0001>
module attributes {stable_mosaic.version = 11 : i64} {
  func.func @caser_kernel(%arg0: i32, %arg1: memref<128x32xf32, #tpu.memory_space<vmem>>, %arg2: memref<4x32x12xf32, #tpu.memory_space<vmem>>, %arg3: memref<17x128xf32, #tpu.memory_space<vmem>>, %arg4: memref<44x128xf32, #tpu.memory_space<vmem>>, %arg5: memref<1x128xf32, #tpu.memory_space<vmem>>, %arg6: memref<8x128xf32, #tpu.memory_space<vmem>>) attributes {dimension_semantics = [#tpu.dimension_semantics<parallel>], iteration_bounds = array<i64: 3>, scalar_prefetch = 0 : i64, scratch_operands = 0 : i64, tpu.core_type = #tpu.core_type<tc>, window_params = [{transform_indices = @transform_0, window_bounds = array<i64: 128, 32>}, {pipeline_mode = #tpu.pipeline_mode<synchronous>, transform_indices = @transform_1, window_bounds = array<i64: 4, 32, 12>}, {pipeline_mode = #tpu.pipeline_mode<synchronous>, transform_indices = @transform_2, window_bounds = array<i64: 17, 128>}, {pipeline_mode = #tpu.pipeline_mode<synchronous>, transform_indices = @transform_3, window_bounds = array<i64: 44, 128>}, {pipeline_mode = #tpu.pipeline_mode<synchronous>, transform_indices = @transform_4, window_bounds = array<i64: 1, 128>}, {transform_indices = @transform_5, window_bounds = array<i64: 8, 128>}]} {
    %c0 = arith.constant 0 : index
    %c0_0 = arith.constant 0 : index
    %0 = vector.load %arg1[%c0, %c0_0] : memref<128x32xf32, #tpu.memory_space<vmem>>, vector<128x32xf32>
    %c0_1 = arith.constant 0 : index
    %c0_2 = arith.constant 0 : index
    %c0_3 = arith.constant 0 : index
    %1 = vector.load %arg2[%c0_1, %c0_2, %c0_3] : memref<4x32x12xf32, #tpu.memory_space<vmem>>, vector<1x32x12xf32>
    %2 = vector.shape_cast %1 : vector<1x32x12xf32> to vector<32x12xf32>
    %cst = arith.constant dense<0.000000e+00> : vector<128x12xf32>
    %3 = tpu.matmul %0, %2, %cst {dimension_numbers = #tpu.dot_dimension_numbers<[1], [0], [0], [1], [0, 0, 1, 1], [], []>} : vector<128x32xf32>, vector<32x12xf32>, vector<128x12xf32> -> vector<128x12xf32>
    %4 = vector.shape_cast %3 : vector<128x12xf32> to vector<8x16x12xf32>
    %5 = vector.extract_strided_slice %4 {offsets = [0, 0, 0], sizes = [8, 7, 12], strides = [1, 1, 1]} : vector<8x16x12xf32> to vector<8x7x12xf32>
    %c1 = arith.constant 1 : index
    %c0_4 = arith.constant 0 : index
    %c0_5 = arith.constant 0 : index
    %6 = vector.load %arg2[%c1, %c0_4, %c0_5] : memref<4x32x12xf32, #tpu.memory_space<vmem>>, vector<1x32x12xf32>
    %7 = vector.shape_cast %6 : vector<1x32x12xf32> to vector<32x12xf32>
    %cst_6 = arith.constant dense<0.000000e+00> : vector<128x12xf32>
    %8 = tpu.matmul %0, %7, %cst_6 {dimension_numbers = #tpu.dot_dimension_numbers<[1], [0], [0], [1], [0, 0, 1, 1], [], []>} : vector<128x32xf32>, vector<32x12xf32>, vector<128x12xf32> -> vector<128x12xf32>
    %9 = vector.shape_cast %8 : vector<128x12xf32> to vector<8x16x12xf32>
    %10 = vector.extract_strided_slice %9 {offsets = [0, 1, 0], sizes = [8, 7, 12], strides = [1, 1, 1]} : vector<8x16x12xf32> to vector<8x7x12xf32>
    %11 = arith.addf %5, %10 : vector<8x7x12xf32>
    %c2 = arith.constant 2 : index
    %c0_7 = arith.constant 0 : index
    %c0_8 = arith.constant 0 : index
    %12 = vector.load %arg2[%c2, %c0_7, %c0_8] : memref<4x32x12xf32, #tpu.memory_space<vmem>>, vector<1x32x12xf32>
    %13 = vector.shape_cast %12 : vector<1x32x12xf32> to vector<32x12xf32>
    %cst_9 = arith.constant dense<0.000000e+00> : vector<128x12xf32>
    %14 = tpu.matmul %0, %13, %cst_9 {dimension_numbers = #tpu.dot_dimension_numbers<[1], [0], [0], [1], [0, 0, 1, 1], [], []>} : vector<128x32xf32>, vector<32x12xf32>, vector<128x12xf32> -> vector<128x12xf32>
    %15 = vector.shape_cast %14 : vector<128x12xf32> to vector<8x16x12xf32>
    %16 = vector.extract_strided_slice %15 {offsets = [0, 2, 0], sizes = [8, 7, 12], strides = [1, 1, 1]} : vector<8x16x12xf32> to vector<8x7x12xf32>
    %17 = arith.addf %11, %16 : vector<8x7x12xf32>
    %c3 = arith.constant 3 : index
    %c0_10 = arith.constant 0 : index
    %c0_11 = arith.constant 0 : index
    %18 = vector.load %arg2[%c3, %c0_10, %c0_11] : memref<4x32x12xf32, #tpu.memory_space<vmem>>, vector<1x32x12xf32>
    %19 = vector.shape_cast %18 : vector<1x32x12xf32> to vector<32x12xf32>
    %cst_12 = arith.constant dense<0.000000e+00> : vector<128x12xf32>
    %20 = tpu.matmul %0, %19, %cst_12 {dimension_numbers = #tpu.dot_dimension_numbers<[1], [0], [0], [1], [0, 0, 1, 1], [], []>} : vector<128x32xf32>, vector<32x12xf32>, vector<128x12xf32> -> vector<128x12xf32>
    %21 = vector.shape_cast %20 : vector<128x12xf32> to vector<8x16x12xf32>
    %22 = vector.extract_strided_slice %21 {offsets = [0, 3, 0], sizes = [8, 7, 12], strides = [1, 1, 1]} : vector<8x16x12xf32> to vector<8x7x12xf32>
    %23 = arith.addf %17, %22 : vector<8x7x12xf32>
    %c8 = arith.constant 8 : index
    %c0_13 = arith.constant 0 : index
    %24 = vector.load %arg3[%c8, %c0_13] : memref<17x128xf32, #tpu.memory_space<vmem>>, vector<1x12xf32>
    %25 = vector.shape_cast %24 : vector<1x12xf32> to vector<1x1x12xf32>
    %26 = vector.broadcast %25 : vector<1x1x12xf32> to vector<8x7x12xf32>
    %27 = arith.addf %23, %26 : vector<8x7x12xf32>
    %cst_14 = arith.constant 0.000000e+00 : f32
    %28 = vector.broadcast %cst_14 : f32 to vector<8x7x12xf32>
    %29 = arith.maximumf %27, %28 : vector<8x7x12xf32>
    %c10 = arith.constant 10 : index
    %c0_15 = arith.constant 0 : index
    %30 = vector.load %arg3[%c10, %c0_15] : memref<17x128xf32, #tpu.memory_space<vmem>>, vector<7x12xf32>
    %31 = vector.shape_cast %30 : vector<7x12xf32> to vector<1x7x12xf32>
    %32 = vector.broadcast %31 : vector<1x7x12xf32> to vector<8x7x12xf32>
    %33 = arith.mulf %29, %32 : vector<8x7x12xf32>
    %cst_16 = arith.constant dense<0xFF800000> : vector<8x12xf32>
    %34 = vector.multi_reduction <maximumf>, %33, %cst_16 [1] : vector<8x7x12xf32> to vector<8x12xf32>
    %c0_17 = arith.constant 0 : index
    %c0_18 = arith.constant 0 : index
    %35 = vector.load %arg3[%c0_17, %c0_18] : memref<17x128xf32, #tpu.memory_space<vmem>>, vector<8x128xf32>
    %c9 = arith.constant 9 : index
    %c0_19 = arith.constant 0 : index
    %36 = vector.load %arg3[%c9, %c0_19] : memref<17x128xf32, #tpu.memory_space<vmem>>, vector<1x1xf32>
    %cst_20 = arith.constant dense<0.000000e+00> : vector<8x32xf32>
    %37 = tpu.matmul %35, %0, %cst_20 {dimension_numbers = #tpu.dot_dimension_numbers<[1], [0], [0], [1], [0, 0, 1, 1], [], []>} : vector<8x128xf32>, vector<128x32xf32>, vector<8x32xf32> -> vector<8x32xf32>
    %38 = vector.broadcast %36 : vector<1x1xf32> to vector<8x32xf32>
    %39 = arith.addf %37, %38 : vector<8x32xf32>
    %cst_21 = arith.constant 0.000000e+00 : f32
    %40 = vector.broadcast %cst_21 : f32 to vector<8x32xf32>
    %41 = arith.maximumf %39, %40 : vector<8x32xf32>
    %42 = tpu.concatenate %34, %41 in 1 : vector<8x12xf32>, vector<8x32xf32> -> vector<8x44xf32>
    %c0_22 = arith.constant 0 : index
    %c0_23 = arith.constant 0 : index
    %43 = vector.load %arg4[%c0_22, %c0_23] : memref<44x128xf32, #tpu.memory_space<vmem>>, vector<44x128xf32>
    %cst_24 = arith.constant dense<0.000000e+00> : vector<8x128xf32>
    %44 = tpu.matmul %42, %43, %cst_24 {dimension_numbers = #tpu.dot_dimension_numbers<[1], [0], [0], [1], [0, 0, 1, 1], [], []>} : vector<8x44xf32>, vector<44x128xf32>, vector<8x128xf32> -> vector<8x128xf32>
    %c0_25 = arith.constant 0 : index
    %c0_26 = arith.constant 0 : index
    %45 = vector.load %arg5[%c0_25, %c0_26] : memref<1x128xf32, #tpu.memory_space<vmem>>, vector<1x128xf32>
    %46 = vector.broadcast %45 : vector<1x128xf32> to vector<8x128xf32>
    %47 = arith.addf %44, %46 : vector<8x128xf32>
    %c0_27 = arith.constant 0 : index
    %c0_28 = arith.constant 0 : index
    %48 = vector.load %arg6[%c0_27, %c0_28] : memref<8x128xf32, #tpu.memory_space<vmem>>, vector<8x128xf32>
    tpu.vector_store %arg6[%c0_27, %c0_28], %47 {strides = array<i32>} : memref<8x128xf32, #tpu.memory_space<vmem>>, vector<8x128xf32>,
    return
  }
  func.func @transform_0(%arg0: i32) -> (i32, i32) {
    %c0_i32 = arith.constant 0 : i32
    %c0_i32_0 = arith.constant 0 : i32
    return %arg0, %c0_i32 : i32, i32
  }
  func.func @transform_1(%arg0: i32) -> (i32, i32, i32) {
    %c0_i32 = arith.constant 0 : i32
    %c0_i32_0 = arith.constant 0 : i32
    %c0_i32_1 = arith.constant 0 : i32
    %c0_i32_2 = arith.constant 0 : i32
    return %c0_i32, %c0_i32_0, %c0_i32_1 : i32, i32, i32
  }
  func.func @transform_2(%arg0: i32) -> (i32, i32) {
    %c0_i32 = arith.constant 0 : i32
    %c0_i32_0 = arith.constant 0 : i32
    %c0_i32_1 = arith.constant 0 : i32
    return %c0_i32, %c0_i32_0 : i32, i32
  }
  func.func @transform_3(%arg0: i32) -> (i32, i32) {
    %c0_i32 = arith.constant 0 : i32
    %c0_i32_0 = arith.constant 0 : i32
    %c0_i32_1 = arith.constant 0 : i32
    return %c0_i32, %c0_i32_0 : i32, i32
  }
  func.func @transform_4(%arg0: i32) -> (i32, i32) {
    %c0_i32 = arith.constant 0 : i32
    %c0_i32_0 = arith.constant 0 : i32
    %c0_i32_1 = arith.constant 0 : i32
    return %c0_i32, %c0_i32_0 : i32, i32
  }
  func.func @transform_5(%arg0: i32) -> (i32, i32) {
    %c0_i32 = arith.constant 0 : i32
    %c0_i32_0 = arith.constant 0 : i32
    return %arg0, %c0_i32 : i32, i32
  }
}

</mosaic_0001>

<bundles_post_ra>
// kernel: caser_forward.1
= control target key start
LH: loop header
LB: loop body
LE: loop exit
PB: predicated region body
PF: predicated region fallthrough
CT: control target
= control target key end

     0   :  { %10 = vsyncpa [#allocation3], 0  ;;  %s2336_s0 = inlined_call_operand.vmem [shape: f32[384,32], index: 0, kind: input, shape index: {}]   ;;  %s2337_s1 = inlined_call_operand.vmem [shape: f32[4,32,12], index: 1, kind: input, shape index: {}]   ;;  %s2338_s2 = inlined_call_operand.vmem [shape: f32[17,128], index: 2, kind: input, shape index: {}]   ;;  %s2339_s3 = inlined_call_operand.vmem [shape: f32[44,128], index: 3, kind: input, shape index: {}]   ;;  %s2340_s4 = inlined_call_operand.vmem [shape: f32[1,128], index: 4, kind: input, shape index: {}]   ;;  %s2341_s5 = inlined_call_operand.hbm [shape: f32[24,128], index: 5, kind: output, shape index: {}]  }
   0x1   :  { %12 = vsyncpa [#allocation3 + $0x1], 0  ;;  %s1890_s18 = smov 0   ;;  %s1892_s19 = smov 0  }
   0x2   :  { %s1894_s20 = smov 0   ;;  %s1896_s21 = smov 0  }
   0x3 LB: > { %s1911_s22 = sadd.s32 4294967295, %s1854_s21   ;;  %s1377_s23 = sadd.s32 4294967294, %s1854_s21   ;;  %s1854_s21 = sphi %s1896_s21, %s2347_s21   ;;  %s1850_s20 = sphi %s1894_s20, %s2346_s20   ;;  %s1846_s19 = sphi %s1892_s19, %s2345_s19   ;;  %s1842_s18 = sphi %s1890_s18, %s2344_s18  }
   0x4   : > { %s1915_s24 = sadd.s32 1, %s1854_s21   ;;  %s135_s25 = sadd.s32 1, %s1850_s20 }
   0x5   : > { %s132_s26 = ssub.s32 %s1854_s21, %s1915_s24  ;;  %p145_p0 = scmp.ne.s32.totalorder %s1850_s20, %s1846_s19 }
   0x6   : > { %p133_p1 = scmp.eq.s32.totalorder %s132_s26, 0  ;;  %p146_p2 = scmp.eq.s32.totalorder %s1911_s22, 2 }
   0x7   : > { %p151_p3 = scmp.ne.s32.totalorder %s1846_s19, %s1842_s18  ;;  %p152_p4 = scmp.eq.s32.totalorder %s1377_s23, 2 }
   0x8   : > { %s1926_s27 = scalar_select %p133_p1, %s1850_s20, %s135_s25  }
   0x9   : > { %p1928_p5 = por %p146_p2, %p145_p0  ;;  %p1932_p6 = por %p152_p4, %p151_p3 }
   0xa   : > { %p1380_p7 = scmp.ge.s32.totalorder %s1854_s21, 1  ;;  %p191_p8 = scmp.lt.s32.totalorder %s1854_s21, 4 }
   0xc   : > { %p192_p9 = pnand %p1380_p7, %p191_p8 }
   0xd   : > { %s1382_s11 = sshll.u32 (!%p192_p9), %s1911_s22, 4  ;;  %s1858_s15 = smov (!%p192_p9), 12  }
   0xe   : > { %195 = sbr.rel (%p192_p9) target bundleno = 617 (0x269), region = 40  ;;  %p220_p10 = scmp.lt.s32.totalorder (!%p192_p9), %s1382_s11, 47 }
   0xf   : > { %s216_s16 = sand.u32 (!%p192_p9), 1, %s1846_s19   ;;  %s1465_s26 = sshll.u32 (!%p192_p9), %s1911_s22, 7 }
  0x10   : > { %s1381_s17 = sshll.u32 (!%p192_p9), %s216_s16, 3  ;;  %s2301_s10 = scalar_lea.hbm (!%p192_p9), %s2341_s5, %s1465_s26 }
  0x11   : > { %s218_s30 = scalar_lea.vmem (!%p192_p9), [#allocation2], %s1381_s17  ;;  %s1859_s12 = smov (!%p192_p9), [#allocation2]  }
  0x12   : > { %s1798_s22 = sshll.u32 (!%p192_p9), %s1859_s12, 4  ;;  %s1799_s22 = int_to_ptr.vmem [resolvable:$false] %s1798_s22 }
  0x13   : > { %v244_v0 = vld [vmem:[%s2337_s1 + $0x18] sm:$0xff]  ;;  %v243_v2 = vld [vmem:[%s2337_s1 + $0x10] sm:$0xff]  ;;  %v242_v4 = vld [vmem:[%s2337_s1 + $0x8] sm:$0xff]  ;;  %s2349_s11 = smov (!%p220_p10, %s1382_s11), 47  ;;  %vm245_vm0 = vcmask 261120   ;;  %v1856_v27 = vmov 0.0  }
  0x14   : > { %v1403_v1 = vld [vmem:[%s2337_s1 + $0x38] sm:$0xff]  ;;  %1572 = vmatprep.subr.mxu0 %v244_v0  ;;  %v1402_v3 = vld [vmem:[%s2337_s1 + $0x30] sm:$0xff]  ;;  %v1401_v5 = vld [vmem:[%s2337_s1 + $0x28] sm:$0xff]  ;;  %s1383_s6 = sshll.u32 %s2349_s11, 3  ;;  %vm1857_vm1 = vmmov 0   ;;  %vm1229_vm2 = vcmask 1043456  }
  0x15   : > { %1604 = vmatprep.subr.mxu1 %v1403_v1  ;;  %1573 = vmatpush3.msra.mxu0 %v244_v0  ;;  %v241_v6 = vld [vmem:[%s2337_s1] sm:$0xff]  ;;  %s1966_s9 = scalar_lea.vmem %s2336_s0, %s1383_s6  ;;  %v1423_v10 = vld [vmem:[%s2337_s1 + $0x58] sm:$0xff]  ;;  %v1422_v12 = vld [vmem:[%s2337_s1 + $0x50] sm:$0xff]  ;;  %vm771_vm3 = vcmask 1045504   ;;  %vm978_vm4 = vcmask 1044480   ;;  %vm1049_vm5 = vcmask 96256  }
  0x16   : > { %1605 = vmatpush3.msra.mxu1 %v1403_v1  ;;  %1574 = vmatprep.subr.mxu0 %v243_v2  ;;  %v1400_v7 = vld [vmem:[%s2337_s1 + $0x20] sm:$0xff]  ;;  %v1972_v9 = vld [vmem:[%s1966_s9 + $0x8] sm:$0xff]  ;;  %v1980_v11 = vld [vmem:[%s1966_s9 + $0x10] sm:$0xff]  ;;  %vm1191_vm6 = vcmask 1041409   ;;  %vm1193_vm7 = vcmask 1042434   ;;  %vm1195_vm8 = vcmask 1043459  }
  0x17   : > { %1606 = vmatprep.subr.mxu1 %v1402_v3  ;;  %1575 = vmatpush3.msra.mxu0 %v243_v2  ;;  %v1969_v8 = vld [vmem:[%s1966_s9] sm:$0xff]  ;;  %v1443_v13 = vld [vmem:[%s2337_s1 + $0x78] sm:$0xff]  ;;  %v1421_v16 = vld [vmem:[%s2337_s1 + $0x48] sm:$0xff]  ;;  %vm1197_vm9 = vcmask 1044484   ;;  %vm1199_vm10 = vcmask 1045509   ;;  %vm1201_vm11 = vcmask 1046534  }
  0x18   : > { %1607 = vmatpush3.msra.mxu1 %v1402_v3  ;;  %1576 = vmatprep.subr.mxu0 %v242_v4  ;;  %v1997_v14 = vld [vmem:[%s1966_s9 + $0x18] sm:$0xff]  ;;  %v2002_v15 = vld [vmem:[%s1966_s9 + $0x20] sm:$0xff]  ;;  %v1442_v17 = vld [vmem:[%s2337_s1 + $0x70] sm:$0xff]  ;;  %vm1203_vm12 = vcmask 1047559   ;;  %vm1210_vm13 = vcmask 97280   ;;  %vm1225_vm14 = vcmask 359424  }
  0x19   : > { %1608 = vmatprep.subr.mxu1 %v1401_v5  ;;  %1577 = vmatpush3.msra.mxu0 %v242_v4  ;;  %v2019_v18 = vld [vmem:[%s1966_s9 + $0x28] sm:$0xff]  ;;  %v2022_v19 = vld [vmem:[%s1966_s9 + $0x30] sm:$0xff]  ;;  %v1420_v20 = vld [vmem:[%s2337_s1 + $0x40] sm:$0xff]  ;;  %s1318_s6 = sshll.u32 %s218_s30, 4  ;;  %s1800_s13 = scalar_lea.vmem %s1799_s22, 256  ;;  %s1319_s6 = int_to_ptr.vmem [resolvable:$true] %s1318_s6 }
  0x1a   : > { %1609 = vmatpush3.msra.mxu1 %v1401_v5  ;;  %1578 = vmatprep.subr.mxu0 %v241_v6  ;;  %v1441_v21 = vld [vmem:[%s2337_s1 + $0x68] sm:$0xff]  ;;  %v2039_v22 = vld [vmem:[%s1966_s9 + $0x38] sm:$0xff]  ;;  %v2042_v23 = vld [vmem:[%s1966_s9 + $0x40] sm:$0xff]  ;;  %s1794_s11 = scalar_lea.vmem %s1319_s6, 128  ;;  %p1801_p0 = scmp.lt.s32.totalorder %s1319_s6, %s1799_s22 }
  0x1b   : > { %1610 = vmatprep.subr.mxu1 %v1400_v7  ;;  %1579 = vmatpush3.msra.mxu0 %v241_v6  ;;  %v1440_v24 = vld [vmem:[%s2337_s1 + $0x60] sm:$0xff]  ;;  %v2056_v25 = vld [vmem:[%s1966_s9 + $0x48] sm:$0xff]  ;;  %v2059_v26 = vld [vmem:[%s1966_s9 + $0x50] sm:$0xff]  ;;  %p1795_p11 = scmp.ne.s32.totalorder %s1319_s6, %s1794_s11  ;;  %p1802_p1 = scmp.lt.s32.totalorder %s1800_s13, %s1794_s11 }
  0x1c   : > { %1580 = vmatprep.mubr.msk.f32.mxu0 %vm245_vm0, %v1969_v8  ;;  %1611 = vmatpush3.msra.mxu1 %v1400_v7  ;;  %v236_v28 = vld [vmem:[%s1966_s9 + $0x58] sm:$0xff]  ;;  %v2072_v29 = vld [vmem:[%s1966_s9 + $0x60] sm:$0xff]  ;;  %v238_v30 = vld [vmem:[%s1966_s9 + $0x68] sm:$0xff] }
  0x1d   : > { %1612 = vmatprep.mubr.msk.f32.mxu1 %vm245_vm0, %v1969_v8  ;;  %1581 = vmatmul.mubr.msk.f32.vlgmr.msra.gmra.mxu0 %vm245_vm0, %v1972_v9  ;;  %v2083_v31 = vld [vmem:[%s1966_s9 + $0x70] sm:$0xff]  ;;  %v2092_v32 = vld [vmem:[%s1966_s9 + $0x78] sm:$0xff]  ;;  %v1106_v33 = vld [vmem:[%s2338_s2] sm:$0xff]  ;;  %s1305_s9 = scalar_lea.sflag [#allocation3], %s216_s16  ;;  %p1796_p12 = pnand %p1795_p11, %p1928_p5 }
  0x1e   : > { %1613 = vmatmul.mubr.msk.f32.vlgmr.msra.gmra.mxu1 %vm245_vm0, %v1972_v9  ;;  %1636 = vmatprep.subr.mxu0 %v1423_v10  ;;  %v1107_v34 = vld [vmem:[%s2338_s2 + $0x9] sm:$0x1]  ;;  %v1216_v36 = vld [vmem:[%s2339_s3 + $0x20] sm:$0xff]  ;;  %v1215_v37 = vld [vmem:[%s2339_s3 + $0x18] sm:$0xff]  ;;  %p1803_p2 = por %p1802_p1, %p1801_p0 }
  0x1f   : > { %1583 = vmatprep.mubr.msk.f32.mxu0 %vm245_vm0, %v1980_v11  ;;  %1637 = vmatpush3.msra.mxu0 %v1423_v10  ;;  %1750 = vpush %v1107_v34  ;;  %v1217_v35 = vld [vmem:[%s2339_s3 + $0x28] sm:$0xf]  ;;  %v1214_v38 = vld [vmem:[%s2339_s3 + $0x10] sm:$0xff]  ;;  %v1212_v40 = vld [vmem:[%s2339_s3] sm:$0xff]  ;;  %p1797_p13 = pneg %p1796_p12 }
  0x20   : > { %1615 = vmatprep.mubr.msk.f32.mxu1 %vm245_vm0, %v1980_v11  ;;  %1638 = vmatprep.subr.mxu0 %v1422_v12  ;;  %v1213_v39 = vld [vmem:[%s2339_s3 + $0x8] sm:$0xff] }
  0x21   : > { %1668 = vmatprep.subr.mxu1 %v1443_v13  ;;  %1584 = vmatmul.mubr.msk.f32.gmra.mxu0 %vm245_vm0, %v1997_v14  ;;  %p1804_p3 = pnand %p1803_p2, %p1797_p13 }
  0x22   : > { %1616 = vmatmul.mubr.msk.f32.gmra.mxu1 %vm245_vm0, %v1997_v14  ;;  %1586 = vmatprep.mubr.msk.f32.mxu0 %vm245_vm0, %v2002_v15 }
  0x23   : > { %1618 = vmatprep.mubr.msk.f32.mxu1 %vm245_vm0, %v2002_v15  ;;  %1639 = vmatpush3.msra.mxu0 %v1422_v12 }
  0x24   : > { %1669 = vmatpush3.msra.mxu1 %v1443_v13  ;;  %1640 = vmatprep.subr.mxu0 %v1421_v16 }
  0x25   : > { %1670 = vmatprep.subr.mxu1 %v1442_v17  ;;  %1587 = vmatmul.mubr.msk.f32.gmra.mxu0 %vm245_vm0, %v2019_v18 }
  0x26   : > { %1619 = vmatmul.mubr.msk.f32.gmra.mxu1 %vm245_vm0, %v2019_v18  ;;  %1589 = vmatprep.mubr.msk.f32.mxu0 %vm245_vm0, %v2022_v19 }
  0x27   : > { %1621 = vmatprep.mubr.msk.f32.mxu1 %vm245_vm0, %v2022_v19  ;;  %1641 = vmatpush3.msra.mxu0 %v1421_v16 }
  0x28   : > { %1671 = vmatpush3.msra.mxu1 %v1442_v17  ;;  %1642 = vmatprep.subr.mxu0 %v1420_v20 }
  0x29   : > { %1672 = vmatprep.subr.mxu1 %v1441_v21  ;;  %1590 = vmatmul.mubr.msk.f32.gmra.mxu0 %vm245_vm0, %v2039_v22 }
  0x2a   : > { %1622 = vmatmul.mubr.msk.f32.gmra.mxu1 %vm245_vm0, %v2039_v22  ;;  %1592 = vmatprep.mubr.msk.f32.mxu0 %vm245_vm0, %v2042_v23 }
  0x2b   : > { %1624 = vmatprep.mubr.msk.f32.mxu1 %vm245_vm0, %v2042_v23  ;;  %1643 = vmatpush3.msra.mxu0 %v1420_v20 }
  0x2c   : > { %1673 = vmatpush3.msra.mxu1 %v1441_v21  ;;  %1700 = vmatprep.subr.mxu0 %v1856_v27 }
  0x2d   : > { %1674 = vmatprep.subr.mxu1 %v1440_v24  ;;  %1593 = vmatmul.mubr.msk.f32.gmra.mxu0 %vm245_vm0, %v2056_v25 }
  0x2e   : > { %1625 = vmatmul.mubr.msk.f32.gmra.mxu1 %vm245_vm0, %v2056_v25  ;;  %1595 = vmatprep.mubr.msk.f32.mxu0 %vm245_vm0, %v2059_v26 }
  0x2f   : > { %1627 = vmatprep.mubr.msk.f32.mxu1 %vm245_vm0, %v2059_v26  ;;  %1675 = vmatpush3.msra.mxu1 %v1440_v24 }
  0x30   : > { %1735 = vmatprep.subr.mxu1 %v1856_v27 }
  0x31   : > { %1596 = vmatmul.mubr.msk.f32.gmra.mxu0 %vm245_vm0, %v236_v28 }
  0x32   : > { %1628 = vmatmul.mubr.msk.f32.gmra.mxu1 %vm245_vm0, %v236_v28  ;;  %1598 = vmatprep.mubr.msk.f32.mxu0 %vm245_vm0, %v2072_v29 }
  0x33   : > { %1630 = vmatprep.mubr.msk.f32.mxu1 %vm245_vm0, %v2072_v29 }
  0x35   : > { %1599 = vmatmul.mubr.msk.f32.gmra.mxu0 %vm245_vm0, %v238_v30 }
  0x36   : > { %1631 = vmatmul.mubr.msk.f32.gmra.mxu1 %vm245_vm0, %v238_v30  ;;  %1601 = vmatprep.mubr.msk.f32.mxu0 %vm245_vm0, %v2083_v31 }
  0x37   : > { %1633 = vmatprep.mubr.msk.f32.mxu1 %vm245_vm0, %v2083_v31 }
  0x39   : > { %1602 = vmatmul.mubr.msk.f32.gmra.mxu0 %vm245_vm0, %v2092_v32 }
  0x3a   : > { %1634 = vmatmul.mubr.msk.f32.gmra.mxu1 %vm245_vm0, %v2092_v32  ;;  %1644 = vmatprep.mubr.msk.f32.mxu0 %vm245_vm0, %v1969_v8 }
  0x3b   : > { %1676 = vmatprep.mubr.msk.f32.mxu1 %vm245_vm0, %v1969_v8 }
  0x3d   : > { %1645 = vmatmul.mubr.msk.f32.vlgmr.msra.gmra.mxu0 %vm245_vm0, %v1972_v9 }
  0x3e   : > { %1677 = vmatmul.mubr.msk.f32.vlgmr.msra.gmra.mxu1 %vm245_vm0, %v1972_v9  ;;  %1701 = vmatpush3.msra.mxu0 %v2092_v32 }
  0x3f   : > { %1647 = vmatprep.mubr.msk.f32.mxu0 %vm245_vm0, %v1980_v11  ;;  %1702 = vmatprep.subr.mxu0 %v1856_v27 }
  0x40   : > { %1679 = vmatprep.mubr.msk.f32.mxu1 %vm245_vm0, %v1980_v11  ;;  %1703 = vmatpush3.msra.mxu0 %v2083_v31 }
  0x41   : > { %1648 = vmatmul.mubr.msk.f32.gmra.mxu0 %vm245_vm0, %v1997_v14  ;;  %1704 = vmatprep.subr.mxu0 %v1856_v27 }
  0x42   : > { %1705 = vmatpush3.msra.mxu0 %v238_v30  ;;  %1680 = vmatmul.mubr.msk.f32.gmra.mxu1 %vm245_vm0, %v1997_v14 }
  0x43   : > { %1706 = vmatprep.subr.mxu0 %v1856_v27  ;;  %1650 = vmatprep.mubr.msk.f32.mxu0 %vm245_vm0, %v2002_v15 }
  0x44   : > { %1707 = vmatpush3.msra.mxu0 %v2072_v29  ;;  %1682 = vmatprep.mubr.msk.f32.mxu1 %vm245_vm0, %v2002_v15 }
  0x45   : > { %1651 = vmatmul.mubr.msk.f32.gmra.mxu0 %vm245_vm0, %v2019_v18  ;;  %1708 = vmatprep.subr.mxu0 %v1856_v27 }
  0x46   : > { %1709 = vmatpush3.msra.mxu0 %v236_v28  ;;  %1683 = vmatmul.mubr.msk.f32.gmra.mxu1 %vm245_vm0, %v2019_v18 }
  0x47   : > { %1710 = vmatprep.subr.mxu0 %v1856_v27  ;;  %1653 = vmatprep.mubr.msk.f32.mxu0 %vm245_vm0, %v2022_v19 }
  0x48   : > { %1711 = vmatpush3.msra.mxu0 %v2059_v26  ;;  %1685 = vmatprep.mubr.msk.f32.mxu1 %vm245_vm0, %v2022_v19 }
  0x49   : > { %1654 = vmatmul.mubr.msk.f32.gmra.mxu0 %vm245_vm0, %v2039_v22  ;;  %1712 = vmatprep.subr.mxu0 %v1856_v27 }
  0x4a   : > { %1713 = vmatpush3.msra.mxu0 %v2056_v25  ;;  %1686 = vmatmul.mubr.msk.f32.gmra.mxu1 %vm245_vm0, %v2039_v22 }
  0x4b   : > { %1714 = vmatprep.subr.mxu0 %v1856_v27  ;;  %1656 = vmatprep.mubr.msk.f32.mxu0 %vm245_vm0, %v2042_v23 }
  0x4c   : > { %1715 = vmatpush3.msra.mxu0 %v2042_v23  ;;  %1688 = vmatprep.mubr.msk.f32.mxu1 %vm245_vm0, %v2042_v23 }
  0x4d   : > { %1657 = vmatmul.mubr.msk.f32.gmra.mxu0 %vm245_vm0, %v2056_v25  ;;  %1716 = vmatprep.subr.mxu0 %v1856_v27 }
  0x4e   : > { %1717 = vmatpush3.msra.mxu0 %v2039_v22  ;;  %1689 = vmatmul.mubr.msk.f32.gmra.mxu1 %vm245_vm0, %v2056_v25 }
  0x4f   : > { %1718 = vmatprep.subr.mxu0 %v1856_v27  ;;  %1659 = vmatprep.mubr.msk.f32.mxu0 %vm245_vm0, %v2059_v26 }
  0x50   : > { %1719 = vmatpush3.msra.mxu0 %v2022_v19  ;;  %1691 = vmatprep.mubr.msk.f32.mxu1 %vm245_vm0, %v2059_v26  ;;  %s2248_s14 = spop %1750 }
  0x51   : > { %1660 = vmatmul.mubr.msk.f32.gmra.mxu0 %vm245_vm0, %v236_v28  ;;  %1720 = vmatprep.subr.mxu0 %v1856_v27 }
  0x52   : > { %1721 = vmatpush3.msra.mxu0 %v2019_v18  ;;  %1692 = vmatmul.mubr.msk.f32.gmra.mxu1 %vm245_vm0, %v236_v28 }
  0x53   : > { %1722 = vmatprep.subr.mxu0 %v1856_v27  ;;  %1662 = vmatprep.mubr.msk.f32.mxu0 %vm245_vm0, %v2072_v29 }
  0x54   : > { %1723 = vmatpush3.msra.mxu0 %v2002_v15  ;;  %1694 = vmatprep.mubr.msk.f32.mxu1 %vm245_vm0, %v2072_v29 }
  0x55   : > { %1663 = vmatmul.mubr.msk.f32.gmra.mxu0 %vm245_vm0, %v238_v30  ;;  %1724 = vmatprep.subr.mxu0 %v1856_v27 }
  0x56   : > { %1725 = vmatpush3.msra.mxu0 %v1997_v14  ;;  %1695 = vmatmul.mubr.msk.f32.gmra.mxu1 %vm245_vm0, %v238_v30 }
  0x57   : > { %1726 = vmatprep.subr.mxu0 %v1856_v27  ;;  %1665 = vmatprep.mubr.msk.f32.mxu0 %vm245_vm0, %v2083_v31 }
  0x58   : > { %1727 = vmatpush3.msra.mxu0 %v1980_v11  ;;  %1697 = vmatprep.mubr.msk.f32.mxu1 %vm245_vm0, %v2083_v31 }
  0x59   : > { %1666 = vmatmul.mubr.msk.f32.gmra.mxu0 %vm245_vm0, %v2092_v32  ;;  %1728 = vmatprep.subr.mxu0 %v1856_v27 }
  0x5a   : > { %1729 = vmatpush3.msra.mxu0 %v1972_v9  ;;  %1698 = vmatmul.mubr.msk.f32.gmra.mxu1 %vm245_vm0, %v2092_v32 }
  0x5b   : > { %1730 = vmatprep.subr.mxu0 %v1856_v27  ;;  %1732 = vmatprep.mubr.msk.f32.mxu0 %vm1857_vm1, %v1856_v27 }
  0x5c   : > { %1731 = vmatpush3.msra.mxu0 %v1969_v8  ;;  %1747 = vmatprep.mubr.msk.f32.mxu1 %vm1857_vm1, %v1856_v27 }
  0x5d   : > { %1733 = vmatmul.mubr.f32.vlgmr.msra.gmra.mxu0 %v1106_v33  ;;  %1736 = vmatpush3.msk.msra.mxu1 %vm1229_vm2, %v1217_v35 }
  0x5e   : > { %1737 = vmatprep.subr.mxu1 %v1856_v27 }
  0x5f   : > { %1738 = vmatpush3.msra.mxu1 %v1216_v36 }
  0x60   : > { %1739 = vmatprep.subr.mxu1 %v1856_v27 }
  0x61   : > { %1740 = vmatpush3.msra.mxu1 %v1215_v37 }
  0x62   : > { %1741 = vmatprep.subr.mxu1 %v1856_v27 }
  0x63   : > { %1742 = vmatpush3.msra.mxu1 %v1214_v38 }
  0x64   : > { %1743 = vmatprep.subr.mxu1 %v1856_v27 }
  0x65   : > { %1744 = vmatpush3.msra.mxu1 %v1213_v39  ;;  %v2233_v39 = vld [vmem:[%s2338_s2 + $0x8] ss:$0 sm:$0xff] }
  0x66   : > { %1745 = vmatprep.subr.mxu1 %v1856_v27 }
  0x67   : > { %1746 = vmatpush3.msra.mxu1 %v1212_v40 }
  0xdd   : > { %v1582_v41 = vpop.f32.mrf.mxu0 }
  0xde   : > { %v1614_v42 = vpop.f32.mrf.mxu1 }
  0xdf   : > { %v360_v43 = vpop.f32.mrf.mxu0 }
  0xe0   : > { %v502_v44 = vpop.f32.mrf.mxu1 }
  0xe1   : > { %v581_v45 = vrot.slane %v502_v44, 1  ;;  %v1585_v46 = vpop.f32.mrf.mxu0 }
  0xe2   : > { %v1617_v47 = vpop.f32.mrf.mxu1 }
  0xe3   : > { %v597_v48 = vadd.f32 %v581_v45, %v360_v43  ;;  %v369_v49 = vpop.f32.mrf.mxu0 }
  0xe4   : > { %v511_v50 = vpop.f32.mrf.mxu1 }
  0xe5   : > { %v582_v51 = vrot.slane %v511_v50, 1  ;;  %v1588_v52 = vpop.f32.mrf.mxu0 }
  0xe6   : > { %v1620_v53 = vpop.f32.mrf.mxu1  ;;  %v2241_v52 = vld [vmem:[%s2338_s2 + $0xa] sm:$0x7f] }
  0xe7   : > { %v598_v54 = vadd.f32 %v582_v51, %v369_v49  ;;  %v378_v55 = vpop.f32.mrf.mxu0 }
  0xe8   : > { %v520_v56 = vpop.f32.mrf.mxu1 }
  0xe9   : > { %v583_v57 = vrot.slane %v520_v56, 1  ;;  %v1591_v58 = vpop.f32.mrf.mxu0 }
  0xea   : > { %v1623_v59 = vpop.f32.mrf.mxu1 }
  0xeb   : > { %v2218_v60 = vadd.f32 %v583_v57, %v378_v55  ;;  %v387_v61 = vpop.f32.mrf.mxu0 }
  0xec   : > { %v529_v62 = vpop.f32.mrf.mxu1 }
  0xed   : > { %v584_v63 = vrot.slane %v529_v62, 1  ;;  %v1594_v0 = vpop.f32.mrf.mxu0 }
  0xee   : > { %v1626_v1 = vpop.f32.mrf.mxu1 }
  0xef   : > { %v2220_v2 = vadd.f32 %v584_v63, %v387_v61  ;;  %v396_v3 = vpop.f32.mrf.mxu0 }
  0xf0   : > { %v538_v4 = vpop.f32.mrf.mxu1 }
  0xf1   : > { %v585_v5 = vrot.slane %v538_v4, 1  ;;  %v1597_v6 = vpop.f32.mrf.mxu0 }
  0xf2   : > { %v1629_v7 = vpop.f32.mrf.mxu1 }
  0xf3   : > { %v2222_v8 = vadd.f32 %v585_v5, %v396_v3  ;;  %v405_v9 = vpop.f32.mrf.mxu0 }
  0xf4   : > { %v547_v10 = vpop.f32.mrf.mxu1 }
  0xf5   : > { %v586_v11 = vrot.slane %v547_v10, 1  ;;  %v1600_v12 = vpop.f32.mrf.mxu0 }
  0xf6   : > { %v1632_v13 = vpop.f32.mrf.mxu1 }
  0xf7   : > { %v2224_v14 = vadd.f32 %v586_v11, %v405_v9  ;;  %v414_v15 = vpop.f32.mrf.mxu0 }
  0xf8   : > { %v556_v16 = vpop.f32.mrf.mxu1 }
  0xf9   : > { %v587_v17 = vrot.slane %v556_v16, 1  ;;  %v1603_v18 = vpop.f32.mrf.mxu0 }
  0xfa   : > { %v1635_v19 = vpop.f32.mrf.mxu1 }
  0xfb   : > { %v2226_v20 = vadd.f32 %v587_v17, %v414_v15  ;;  %v423_v21 = vpop.f32.mrf.mxu0 }
  0xfc   : > { %v565_v22 = vpop.f32.mrf.mxu1 }
  0xfd   : > { %v1646_v23 = vpop.f32.mrf.mxu0  ;;  %v588_v62 = vrot.slane %v565_v22, 1  ;;  %v1110_v22 = vstv %s2248_s14 }
  0xfe   : > { %v1678_v24 = vpop.f32.mrf.mxu1  ;;  %v773_v28 = vrot.slane %v1646_v23, 2 }
  0xff   : > { %v980_v25 = vrot.slane %v1678_v24, 3  ;;  %v676_v26 = vpop.f32.mrf.mxu0  ;;  %v2251_v17 = vadd.f32 %v588_v62, %v423_v21 }
 0x100   : > { %v883_v27 = vpop.f32.mrf.mxu1  ;;  %v772_v29 = vrot.slane %v676_v26, 2 }
 0x101   : > { %v979_v30 = vrot.slane %v883_v27, 3  ;;  %v1649_v31 = vpop.f32.mrf.mxu0 }
 0x102   : > { %v774_v32 = vsel %vm771_vm3, %v772_v29, %v773_v28  ;;  %v1681_v34 = vpop.f32.mrf.mxu1  ;;  %v776_v38 = vrot.slane %v1649_v31, 2 }
 0x103   : > { %v981_v33 = vsel %vm978_vm4, %v979_v30, %v980_v25  ;;  %v804_v35 = vadd.f32 %v774_v32, %v597_v48  ;;  %v686_v36 = vpop.f32.mrf.mxu0  ;;  %v983_v37 = vrot.slane %v1681_v34, 3 }
 0x104   : > { %v775_v40 = vrot.slane %v686_v36, 2  ;;  %v893_v41 = vpop.f32.mrf.mxu1 }
 0x105   : > { %v1011_v42 = vadd.f32 %v981_v33, %v804_v35  ;;  %v1652_v43 = vpop.f32.mrf.mxu0  ;;  %v982_v44 = vrot.slane %v893_v41, 3 }
 0x106   : > { %v777_v45 = vsel %vm771_vm3, %v775_v40, %v776_v38  ;;  %v1684_v46 = vpop.f32.mrf.mxu1  ;;  %v779_v53 = vrot.slane %v1652_v43, 2 }
 0x107   : > { %v1024_v47 = vadd.f32 %v2233_v39, %v1011_v42  ;;  %v805_v49 = vadd.f32 %v777_v45, %v598_v54  ;;  %v984_v48 = vsel %vm978_vm4, %v982_v44, %v983_v37  ;;  %v696_v50 = vpop.f32.mrf.mxu0  ;;  %v986_v51 = vrot.slane %v1684_v46, 3 }
 0x108   : > { %v778_v55 = vrot.slane %v696_v50, 2  ;;  %v903_v56 = vpop.f32.mrf.mxu1 }
 0x109   : > { %v1032_v57 = vmax.f32 %v1024_v47, 0.0  ;;  %v1012_v58 = vadd.f32 %v984_v48, %v805_v49  ;;  %v1655_v59 = vpop.f32.mrf.mxu0  ;;  %v985_v61 = vrot.slane %v903_v56, 3 }
 0x10a   : > { %v780_v54 = vsel %vm771_vm3, %v778_v55, %v779_v53  ;;  %v1687_v63 = vpop.f32.mrf.mxu1  ;;  %v782_v6 = vrot.slane %v1655_v59, 2 }
 0x10b   : > { %v1041_v0 = vmul.f32 %v2241_v52, %v1032_v57  ;;  %v1025_v1 = vadd.f32 %v2233_v39, %v1012_v58  ;;  %v806_v3 = vadd.f32 %v780_v54, %v2218_v60  ;;  %v987_v4 = vsel %vm978_vm4, %v985_v61, %v986_v51  ;;  %v706_v5 = vpop.f32.mrf.mxu0 }
 0x10c   : > { %v781_v7 = vrot.slane %v706_v5, 2  ;;  %v989_v9 = vrot.slane %v1687_v63, 3  ;;  %v913_v10 = vpop.f32.mrf.mxu1 }
 0x10d   : > { %v1050_v11 = vsel %vm1049_vm5, %v1041_v0, -inf  ;;  %v1033_v12 = vmax.f32 %v1025_v1, 0.0  ;;  %v1013_v13 = vadd.f32 %v987_v4, %v806_v3  ;;  %v1658_v15 = vpop.f32.mrf.mxu0  ;;  %v988_v16 = vrot.slane %v913_v10, 3 }
 0x10e   : > { %v1051_v18 = vrot.slane %v1050_v11, 4  ;;  %v783_v60 = vsel %vm771_vm3, %v781_v7, %v782_v6  ;;  %v1690_v19 = vpop.f32.mrf.mxu1  ;;  %v785_v29 = vrot.slane %v1658_v15, 2 }
 0x10f   : > { %v1042_v23 = vmul.f32 %v2241_v52, %v1033_v12  ;;  %v1026_v24 = vadd.f32 %v2233_v39, %v1013_v13  ;;  %v807_v25 = vadd.f32 %v783_v60, %v2220_v2  ;;  %v990_v26 = vsel %vm978_vm4, %v988_v16, %v989_v9  ;;  %v716_v27 = vpop.f32.mrf.mxu0 }
 0x110   : > { %v1052_v28 = vmax.f32 %v1050_v11, %v1051_v18  ;;  %v784_v30 = vrot.slane %v716_v27, 2  ;;  %v992_v31 = vrot.slane %v1690_v19, 3  ;;  %v923_v21 = vpop.f32.mrf.mxu1 }
 0x111   : > { %v1057_v32 = vsel %vm1049_vm5, %v1042_v23, -inf  ;;  %v1034_v33 = vmax.f32 %v1026_v24, 0.0  ;;  %v1014_v34 = vadd.f32 %v990_v26, %v807_v25  ;;  %v1661_v35 = vpop.f32.mrf.mxu0  ;;  %v991_v36 = vrot.slane %v923_v21, 3 }
 0x112   : > { %v1053_v37 = vrot.slane %v1052_v28, 2  ;;  %v1058_v38 = vrot.slane %v1057_v32, 4  ;;  %v786_v40 = vsel %vm771_vm3, %v784_v30, %v785_v29  ;;  %v788_v41 = vrot.slane %v1661_v35, 2  ;;  %v1693_v2 = vpop.f32.mrf.mxu1 }
 0x113   : > { %v1043_v42 = vmul.f32 %v2241_v52, %v1034_v33  ;;  %v1027_v43 = vadd.f32 %v2233_v39, %v1014_v34  ;;  %v808_v44 = vadd.f32 %v786_v40, %v2222_v8  ;;  %v993_v45 = vsel %vm978_vm4, %v991_v36, %v992_v31  ;;  %v726_v46 = vpop.f32.mrf.mxu0 }
 0x114   : > { %v1054_v47 = vmax.f32 %v1052_v28, %v1053_v37  ;;  %v1059_v49 = vmax.f32 %v1057_v32, %v1058_v38  ;;  %v787_v48 = vrot.slane %v726_v46, 2  ;;  %v995_v50 = vrot.slane %v1693_v2, 3  ;;  %v933_v51 = vpop.f32.mrf.mxu1 }
 0x115   : > { %v1064_v53 = vsel %vm1049_vm5, %v1043_v42, -inf  ;;  %v1035_v55 = vmax.f32 %v1027_v43, 0.0  ;;  %v1015_v56 = vadd.f32 %v993_v45, %v808_v44  ;;  %v1664_v57 = vpop.f32.mrf.mxu0  ;;  %v994_v58 = vrot.slane %v933_v51, 3 }
 0x116   : > { %v1055_v59 = vrot.slane %v1054_v47, 1  ;;  %v1060_v61 = vrot.slane %v1059_v49, 2  ;;  %v1065_v62 = vrot.slane %v1064_v53, 4  ;;  %v789_v54 = vsel %vm771_vm3, %v787_v48, %v788_v41  ;;  %v1696_v8 = vpop.f32.mrf.mxu1 }
 0x117   : > { %v1044_v63 = vmul.f32 %v2241_v52, %v1035_v55  ;;  %v1028_v0 = vadd.f32 %v2233_v39, %v1015_v56  ;;  %v809_v1 = vadd.f32 %v789_v54, %v2224_v14  ;;  %v791_v3 = vrot.slane %v1664_v57, 2  ;;  %v736_v4 = vpop.f32.mrf.mxu0 }
 0x118   : > { %v1056_v5 = vmax.f32 %v1054_v47, %v1055_v59  ;;  %v1061_v6 = vmax.f32 %v1059_v49, %v1060_v61  ;;  %v1066_v7 = vmax.f32 %v1064_v53, %v1065_v62  ;;  %v996_v9 = vsel %vm978_vm4, %v994_v58, %v995_v50  ;;  %v943_v10 = vpop.f32.mrf.mxu1 }
 0x119   : > { %v1071_v11 = vsel %vm1049_vm5, %v1044_v63, -inf  ;;  %v1036_v12 = vmax.f32 %v1028_v0, 0.0  ;;  %v1016_v13 = vadd.f32 %v996_v9, %v809_v1  ;;  %v790_v15 = vrot.slane %v736_v4, 2  ;;  %v1667_v16 = vpop.f32.mrf.mxu0 }
 0x11a   : > { %v1062_v18 = vrot.slane %v1061_v6, 1  ;;  %v1067_v60 = vrot.slane %v1066_v7, 2  ;;  %v1072_v19 = vrot.slane %v1071_v11, 4  ;;  %v998_v23 = vrot.slane %v1696_v8, 3  ;;  %v1699_v14 = vpop.f32.mrf.mxu1 }
 0x11b   : > { %v1045_v24 = vmul.f32 %v2241_v52, %v1036_v12  ;;  %v1029_v25 = vadd.f32 %v2233_v39, %v1016_v13  ;;  %v792_v26 = vsel %vm771_vm3, %v790_v15, %v791_v3  ;;  %v794_v27 = vrot.slane %v1667_v16, 2  ;;  %v746_v28 = vpop.f32.mrf.mxu0 }
 0x11c   : > { %v1063_v29 = vmax.f32 %v1061_v6, %v1062_v18  ;;  %v1068_v30 = vmax.f32 %v1066_v7, %v1067_v60  ;;  %v1073_v31 = vmax.f32 %v1071_v11, %v1072_v19  ;;  %v810_v21 = vadd.f32 %v792_v26, %v2226_v20  ;;  %v953_v32 = vpop.f32.mrf.mxu1 }
 0x11d   : > { %v1078_v33 = vsel %vm1049_vm5, %v1045_v24, -inf  ;;  %v1037_v34 = vmax.f32 %v1029_v25, 0.0  ;;  %v997_v35 = vrot.slane %v943_v10, 3  ;;  %v793_v36 = vrot.slane %v746_v28, 2  ;;  %v1178_v37 = vpop.f32.mrf.mxu0 }
 0x11e   : > { %v1069_v38 = vrot.slane %v1068_v30, 1  ;;  %v1074_v40 = vrot.slane %v1073_v31, 2  ;;  %v1079_v41 = vrot.slane %v1078_v33, 4  ;;  %v1001_v2 = vrot.slane %v1699_v14, 3 }
 0x11f   : > { %v1046_v42 = vmul.f32 %v2241_v52, %v1037_v34  ;;  %v999_v43 = vsel %vm978_vm4, %v997_v35, %v998_v23  ;;  %v795_v44 = vsel %vm771_vm3, %v793_v36, %v794_v27  ;;  %v1000_v45 = vrot.slane %v953_v32, 3  ;;  %v1734_v20 = vpop.f32.mrf.mxu0  ;;  %v1461_v34 = vld [vmem:[%s2340_s4] ss:$0 sm:$0xff] }
 0x120   : > { %v1070_v46 = vmax.f32 %v1068_v30, %v1069_v38  ;;  %v1075_v47 = vmax.f32 %v1073_v31, %v1074_v40  ;;  %v1080_v49 = vmax.f32 %v1078_v33, %v1079_v41  ;;  %v1017_v48 = vadd.f32 %v999_v43, %v810_v21 }
 0x121   : > { %v1085_v50 = vsel %vm1049_vm5, %v1046_v42, -inf  ;;  %v811_v51 = vadd.f32 %v795_v44, %v2251_v17  ;;  %v1002_v53 = vsel %vm978_vm4, %v1000_v45, %v1001_v2  ;;  %v1179_v55 = vadd.f32 %v1178_v37, %v1110_v22 }
 0x122   : > { %v1076_v56 = vrot.slane %v1075_v47, 1  ;;  %v1081_v57 = vrot.slane %v1080_v49, 2  ;;  %v1086_v58 = vrot.slane %v1085_v50, 4  ;;  %v1030_v59 = vadd.f32 %v2233_v39, %v1017_v48 }
 0x123   : > { %v1018_v61 = vadd.f32 %v1002_v53, %v811_v51  ;;  %v1182_v62 = vmax.f32 %v1179_v55, 0.0  ;;  %v1192_v54 = vsel %vm1191_vm6, %v1063_v29, %v1056_v5 }
 0x124   : > { %v1082_v8 = vmax.f32 %v1080_v49, %v1081_v57  ;;  %v1087_v63 = vmax.f32 %v1085_v50, %v1086_v58  ;;  %v1038_v0 = vmax.f32 %v1030_v59, 0.0  ;;  %v1077_v1 = vmax.f32 %v1075_v47, %v1076_v56 }
 0x125   : > { %v1031_v17 = vadd.f32 %v2233_v39, %v1018_v61  ;;  %1207 = vrot.lane.b32.xlu0 %v1182_v62, %s1858_s15  ;;  %v1194_v22 = vsel %vm1193_vm7, %v1070_v46, %v1192_v54 }
 0x126   : > { %v1088_v3 = vrot.slane %v1087_v63, 2  ;;  %v1047_v4 = vmul.f32 %v2241_v52, %v1038_v0  ;;  %v1083_v6 = vrot.slane %v1082_v8, 1  ;;  %v1196_v7 = vsel %vm1195_vm8, %v1077_v1, %v1194_v22 }
 0x127   : > { %v1039_v9 = vmax.f32 %v1031_v17, 0.0 }
 0x128   : > { %v1092_v5 = vsel %vm1049_vm5, %v1047_v4, -inf  ;;  %v1084_v10 = vmax.f32 %v1082_v8, %v1083_v6  ;;  %v1089_v11 = vmax.f32 %v1087_v63, %v1088_v3 }
 0x129   : > { %v1093_v12 = vrot.slane %v1092_v5, 4  ;;  %v1048_v13 = vmul.f32 %v2241_v52, %v1039_v9 }
 0x12a   : > { %v1090_v15 = vrot.slane %v1089_v11, 1  ;;  %v1198_v39 = vsel %vm1197_vm9, %v1084_v10, %v1196_v7 }
 0x12b   : > { %v1094_v16 = vmax.f32 %v1092_v5, %v1093_v12  ;;  %v1099_v18 = vsel %vm1049_vm5, %v1048_v13, -inf }
 0x12c   : > { %v1100_v60 = vrot.slane %v1099_v18, 4  ;;  %v1091_v19 = vmax.f32 %v1089_v11, %v1090_v15 }
 0x12d   : > { %v1095_v23 = vrot.slane %v1094_v16, 2 }
 0x12e   : > { %v1101_v14 = vmax.f32 %v1099_v18, %v1100_v60  ;;  %v1200_v24 = vsel %vm1199_vm10, %v1091_v19, %v1198_v39 }
 0x12f   : > { %v1096_v25 = vmax.f32 %v1094_v16, %v1095_v23 }
 0x130   : > { %v1102_v26 = vrot.slane %v1101_v14, 2 }
 0x131   : > { %v1097_v27 = vrot.slane %v1096_v25, 1 }
 0x132   : > { %v1103_v28 = vmax.f32 %v1101_v14, %v1102_v26 }
 0x133   : > { %v1098_v29 = vmax.f32 %v1096_v25, %v1097_v27 }
 0x134   : > { %v1104_v52 = vrot.slane %v1103_v28, 1 }
 0x135   : > { %v1202_v30 = vsel %vm1201_vm11, %v1098_v29, %v1200_v24 }
 0x136   : > { %v1105_v31 = vmax.f32 %v1103_v28, %v1104_v52 }
 0x138   : > { %v1204_v21 = vsel %vm1203_vm12, %v1105_v31, %v1202_v30 }
 0x197   : > { %v1208_v32 = vpop.permute.xlu0 %1207 }
 0x198   : > { %v1211_v33 = vsel %vm1210_vm13, %v1204_v21, %v1208_v32 }
 0x199   : > { %1748 = vmatmul.mubr.msk.f32.vlgmr.msra.gmra.mxu1 %vm1225_vm14, %v1211_v33 }
 0x259   : > { %v1299_v35 = vpop.f32.mrf.mxu1 }
 0x25a   : > { %v1300_v36 = vadd.f32 %v1461_v34, %v1299_v35 }
 0x25b   : > { %v1749_v37 = vpop.f32.mrf.mxu1 }
 0x25c   : > { %1303 = vst [vmem:[%s218_s30] sm:$0xff] %v1300_v36 }
 0x25d   : > { %1807 = shalt.err (!%p1804_p3)
}
 0x25e   : > { %s1808_s14 = scalar_lea.hbm %s2301_s10, 128  ;;  %s1812_s17 = scalar_lea.hbm %s2341_s5, 384 }
 0x25f   : > { %p1809_p4 = scmp.ne.s32.totalorder %s2301_s10, %s1808_s14  ;;  %p1813_p9 = scmp.lt.s32.totalorder %s2301_s10, %s2341_s5 }
 0x260   : > { %p1814_p10 = scmp.lt.s32.totalorder %s1812_s17, %s1808_s14 }
 0x261   : > { %p1810_p7 = pnand %p1809_p4, %p1928_p5 }
 0x262   : > { %p1815_p11 = por %p1814_p10, %p1813_p9 }
 0x263   : > { %p1811_p8 = pneg %p1810_p7 }
 0x265   : > { %p1816_p12 = pnand %p1815_p11, %p1811_p8 }
 0x267   : > { %1819 = shalt.err (!%p1816_p12)
}
 0x268   : > { %1752 = dma.vmem_to_hbm [thread:$0]  (%p1928_p5), %s1319_s6, 128, %s2301_s10, %s1305_s9  }
 0x269 PF: > { %p1758_p13 = scmp.ge.s32.totalorder %s1854_s21, 2  ;;  %s1330_s26 = sand.u32 1, %s1842_s18  }
 0x26a   : > { %s1331_s30 = scalar_lea.sflag [#allocation3], %s1330_s26 }
 0x26b   : > { %p1755_p0 = pnand %p1758_p13, %p1932_p6 }
 0x26d   : > { %p1756_p1 = pneg %p1755_p0 }
 0x26f   : > { %1837 = dma.done.wait (%p1756_p1), %s1331_s30, 128  }
 0x270   : > { %1839 = vsyncadd (%p1756_p1), %s1331_s30, 4294967168  ;;  %p15_p2 = scmp.ge.s32.totalorder %s1915_s24, 5   ;;  %s2344_s18 = smov %s1846_s19 }
 0x271   : > { %s2345_s19 = smov %s1850_s20  ;;  %s2346_s20 = smov %s1926_s27 }
 0x272   : > { %s2347_s21 = smov %s1915_s24  ;;  %17 = sbr.rel (!%p15_p2) target bundleno = 3 (0x3), region = 78 }
 0x277   :  { %1336 = vsyncpa [#allocation3], 1 }
 0x278   :  { %1338 = vsyncpa [#allocation3 + $0x1], 1 }

</bundles_post_ra>
